<compile_context>
chip_gen: v7x
topology: tpu7x:2x2x1
jax: 0.10.0
libtpu: 0.0.40
codegen_flags: <defaults>
</compile_context>

<pallas_src>
import math

import jax
import jax.numpy as jnp
from jax import lax
from jax.experimental import pallas as pl
from jax.experimental.pallas import tpu as pltpu

_INV_SQRT2 = 0.7071067811865476


def _gelu_erf(x):
    # Exact GELU (PyTorch nn.GELU() default).
    return 0.5 * x * (1.0 + lax.erf(x * _INV_SQRT2))


def _round_up(v, m):
    return ((v + m - 1) // m) * m


def _mlp_kernel(x_ref, w1_ref, b1_ref, w2_ref, b2_ref, o_ref, acc_ref):
    # x_ref : (TM, Din_p)   bf16  current row tile (resident across hidden steps)
    # w1_ref: (Din_p, TH)   bf16  fc1 weight slice (streamed over hidden axis)
    # b1_ref: (1, TH)       f32   fc1 bias slice
    # w2_ref: (TH, Dout_p)  bf16  fc2 weight slice (streamed over hidden axis)
    # b2_ref: (1, Dout_p)   f32   fc2 bias
    # o_ref : (TM, Dout_p)  f32   output tile (resident across hidden steps)
    # acc_ref: (TM, Dout_p) f32   VMEM accumulator scratch
    h_idx = pl.program_id(1)

    @pl.when(h_idx == 0)
    def _():
        acc_ref[...] = jnp.zeros_like(acc_ref)

    # fc1 slice: bf16 MXU operands, f32 accumulation.
    h = jnp.dot(x_ref[...], w1_ref[...], preferred_element_type=jnp.float32)
    h = h + b1_ref[...]
    h = _gelu_erf(h)

    # fc2 partial product accumulated over hidden tiles.
    acc_ref[...] += jnp.dot(
        h.astype(jnp.bfloat16), w2_ref[...], preferred_element_type=jnp.float32
    )

    @pl.when(h_idx == pl.num_programs(1) - 1)
    def _():
        o_ref[...] = (acc_ref[...] + b2_ref[...]).astype(o_ref.dtype)


def mlp_forward(x, w1, b1, w2, b2, *, tile_m=256, tile_h=512):
    """Mlp forward.

    x : (..., in_features)
    w1: (hidden_features, in_features)   (PyTorch Linear layout)
    b1: (hidden_features,)
    w2: (out_features, hidden_features)
    b2: (out_features,)
    """
    orig_lead = x.shape[:-1]
    d_in = x.shape[-1]
    d_hidden = w1.shape[0]
    d_out = w2.shape[0]
    m = int(math.prod(orig_lead)) if orig_lead else 1

    # ---- lane-dense feature padding (multiples of 128) ----------------------
    din_p = _round_up(d_in, 128)
    dh_p = _round_up(d_hidden, 128)
    dout_p = _round_up(d_out, 128)

    # Hidden tile must divide dh_p exactly (hidden is a reduction axis; partial
    # blocks there would pull unspecified data into the accumulator).
    th = max(128, (min(tile_h, dh_p) // 128) * 128)
    while dh_p % th != 0:
        th -= 128

    # Row tile: multiple of 8, or the full (small) M.
    tm = tile_m if m >= tile_m else m

    # ---- input / weight preparation (bf16 MXU operands, f32 biases) ---------
    x2d = x.reshape(m, d_in).astype(jnp.bfloat16)
    if din_p != d_in:
        x2d = jnp.pad(x2d, ((0, 0), (0, din_p - d_in)))

    w1_p = jnp.pad(w1.T.astype(jnp.bfloat16), ((0, din_p - d_in), (0, dh_p - d_hidden)))
    b1_p = jnp.pad(b1.reshape(1, d_hidden).astype(jnp.float32), ((0, 0), (0, dh_p - d_hidden)))
    w2_p = jnp.pad(w2.T.astype(jnp.bfloat16), ((0, dh_p - d_hidden), (0, dout_p - d_out)))
    b2_p = jnp.pad(b2.reshape(1, d_out).astype(jnp.float32), ((0, 0), (0, dout_p - d_out)))

    grid = (pl.cdiv(m, tm), dh_p // th)

    # ---- explicit VMEM budget ------------------------------------------------
    vmem_bytes = (
        2 * tm * din_p * 2        # x tile (bf16), double-buffered
        + 2 * din_p * th * 2      # W1 slice (bf16)
        + 2 * 8 * th * 4          # b1 slice (f32, sublane-padded)
        + 2 * th * dout_p * 2     # W2 slice (bf16)
        + 2 * 8 * dout_p * 4      # b2 (f32)
        + 2 * tm * dout_p * 4     # output tile (f32)
        + tm * dout_p * 4         # accumulator scratch (f32)
        + 2 * tm * th * 4         # h intermediate / temps (f32)
    )
    vmem_limit = min(max(2 * vmem_bytes, 32 << 20), 64 << 20)

    cost = pl.CostEstimate(
        flops=2 * m * (din_p * dh_p + dh_p * dout_p),
        transcendentals=m * dh_p,
        bytes_accessed=(
            2 * m * din_p + 2 * din_p * dh_p + 2 * dh_p * dout_p
            + 4 * dh_p + 4 * dout_p + 4 * m * dout_p
        ),
    )

    out_pad = pl.pallas_call(
        _mlp_kernel,
        out_shape=jax.ShapeDtypeStruct((m, dout_p), jnp.float32),
        grid=grid,
        in_specs=[
            pl.BlockSpec((tm, din_p), lambda i, h: (i, 0)),    # x rows (resident across h)
            pl.BlockSpec((din_p, th), lambda i, h: (0, h)),    # W1 slice (streamed)
            pl.BlockSpec((1, th), lambda i, h: (0, h)),        # b1 slice
            pl.BlockSpec((th, dout_p), lambda i, h: (h, 0)),   # W2 slice (streamed)
            pl.BlockSpec((1, dout_p), lambda i, h: (0, 0)),    # b2 (constant)
        ],
        out_specs=pl.BlockSpec((tm, dout_p), lambda i, h: (i, 0)),
        scratch_shapes=[pltpu.VMEM((tm, dout_p), jnp.float32)],
        compiler_params=pltpu.CompilerParams(
            dimension_semantics=("parallel", "arbitrary"),
            vmem_limit_bytes=vmem_limit,
        ),
        cost_estimate=cost,
    )(x2d, w1_p, b1_p, w2_p, b2_p)

    out = out_pad[:, :d_out]
    return out.reshape(orig_lead + (d_out,))


def _mlp_reference(x, w1, b1, w2, b2):
    h = x @ w1.T + b1
    h = _gelu_erf(h)
    return h @ w2.T + b2


if __name__ == "__main__":
    key = jax.random.PRNGKey(0)
    k_x, k_w1, k_b1, k_w2, k_b2 = jax.random.split(key, 5)

    B, S = 2, 8
    D_IN, D_HIDDEN, D_OUT = 32, 64, 32

    x = jax.random.normal(k_x, (B, S, D_IN), dtype=jnp.float32)
    w1 = jax.random.normal(k_w1, (D_HIDDEN, D_IN), dtype=jnp.float32) * 0.1
    b1 = jax.random.normal(k_b1, (D_HIDDEN,), dtype=jnp.float32) * 0.1
    w2 = jax.random.normal(k_w2, (D_OUT, D_HIDDEN), dtype=jnp.float32) * 0.1
    b2 = jax.random.normal(k_b2, (D_OUT,), dtype=jnp.float32) * 0.1

    out = mlp_forward(x, w1, b1, w2, b2)
    jax.block_until_ready(out)

    assert out.shape == (B, S, D_OUT)
    ref = _mlp_reference(x, w1, b1, w2, b2)
    # bf16 MXU operands -> ~1e-2-level relative error vs the f32 reference.
    assert bool(jnp.allclose(out, ref, atol=2e-2, rtol=2e-2)), "mismatch vs reference"
    print("KERNEL_OK")
</pallas_src>

<mosaic_0001>
module attributes {stable_mosaic.version = 11 : i64} {
  func.func @_mlp_kernel(%arg0: i32, %arg1: i32, %arg2: memref<16x128xbf16, #tpu.memory_space<vmem>>, %arg3: memref<128x128xbf16, #tpu.memory_space<vmem>>, %arg4: memref<1x128xf32, #tpu.memory_space<vmem>>, %arg5: memref<128x128xbf16, #tpu.memory_space<vmem>>, %arg6: memref<1x128xf32, #tpu.memory_space<vmem>>, %arg7: memref<16x128xf32, #tpu.memory_space<vmem>>, %arg8: memref<16x128xf32, #tpu.memory_space<vmem>>) attributes {dimension_semantics = [#tpu.dimension_semantics<parallel>, #tpu.dimension_semantics<arbitrary>], iteration_bounds = array<i64: 1, 1>, scalar_prefetch = 0 : i64, scratch_operands = 1 : i64, tpu.core_type = #tpu.core_type<tc>, window_params = [{transform_indices = @transform_0, window_bounds = array<i64: 16, 128>}, {transform_indices = @transform_1, window_bounds = array<i64: 128, 128>}, {transform_indices = @transform_2, window_bounds = array<i64: 1, 128>}, {transform_indices = @transform_3, window_bounds = array<i64: 128, 128>}, {pipeline_mode = #tpu.pipeline_mode<synchronous>, transform_indices = @transform_4, window_bounds = array<i64: 1, 128>}, {transform_indices = @transform_5, window_bounds = array<i64: 16, 128>}]} {
    %c0_i32 = arith.constant 0 : i32
    %0 = arith.cmpi eq, %arg1, %c0_i32 : i32
    %1 = arith.extui %0 : i1 to i32
    %c0_i32_0 = arith.constant 0 : i32
    %2 = arith.cmpi ne, %1, %c0_i32_0 : i32
    scf.if %2 {
      %cst_18 = arith.constant 0.000000e+00 : f32
      %26 = vector.broadcast %cst_18 : f32 to vector<16x128xf32>
      %c0_19 = arith.constant 0 : index
      %c0_20 = arith.constant 0 : index
      %27 = vector.load %arg8[%c0_19, %c0_20] : memref<16x128xf32, #tpu.memory_space<vmem>>, vector<16x128xf32>
      tpu.vector_store %arg8[%c0_19, %c0_20], %26 {strides = array<i32>} : memref<16x128xf32, #tpu.memory_space<vmem>>, vector<16x128xf32>,
    } else {
    }
    %c0 = arith.constant 0 : index
    %c0_1 = arith.constant 0 : index
    %3 = vector.load %arg2[%c0, %c0_1] : memref<16x128xbf16, #tpu.memory_space<vmem>>, vector<16x128xbf16>
    %c0_2 = arith.constant 0 : index
    %c0_3 = arith.constant 0 : index
    %4 = vector.load %arg3[%c0_2, %c0_3] : memref<128x128xbf16, #tpu.memory_space<vmem>>, vector<128x128xbf16>
    %cst = arith.constant dense<0.000000e+00> : vector<16x128xf32>
    %5 = tpu.matmul %3, %4, %cst {dimension_numbers = #tpu.dot_dimension_numbers<[1], [0], [0], [1], [0, 0, 1, 1], [], []>} : vector<16x128xbf16>, vector<128x128xbf16>, vector<16x128xf32> -> vector<16x128xf32>
    %c0_4 = arith.constant 0 : index
    %c0_5 = arith.constant 0 : index
    %6 = vector.load %arg4[%c0_4, %c0_5] : memref<1x128xf32, #tpu.memory_space<vmem>>, vector<1x128xf32>
    %7 = vector.broadcast %6 : vector<1x128xf32> to vector<16x128xf32>
    %8 = arith.addf %5, %7 : vector<16x128xf32>
    %cst_6 = arith.constant 5.000000e-01 : f32
    %9 = vector.broadcast %cst_6 : f32 to vector<16x128xf32>
    %10 = arith.mulf %9, %8 : vector<16x128xf32>
    %cst_7 = arith.constant 0.707106769 : f32
    %11 = vector.broadcast %cst_7 : f32 to vector<16x128xf32>
    %12 = arith.mulf %8, %11 : vector<16x128xf32>
    %13 = math.erf %12 : vector<16x128xf32>
    %cst_8 = arith.constant 1.000000e+00 : f32
    %14 = vector.broadcast %cst_8 : f32 to vector<16x128xf32>
    %15 = arith.addf %14, %13 : vector<16x128xf32>
    %16 = arith.mulf %10, %15 : vector<16x128xf32>
    %c0_9 = arith.constant 0 : index
    %c0_10 = arith.constant 0 : index
    %17 = vector.load %arg8[%c0_9, %c0_10] : memref<16x128xf32, #tpu.memory_space<vmem>>, vector<16x128xf32>
    %18 = arith.truncf %16 : vector<16x128xf32> to vector<16x128xbf16>
    %c0_11 = arith.constant 0 : index
    %c0_12 = arith.constant 0 : index
    %19 = vector.load %arg5[%c0_11, %c0_12] : memref<128x128xbf16, #tpu.memory_space<vmem>>, vector<128x128xbf16>
    %cst_13 = arith.constant dense<0.000000e+00> : vector<16x128xf32>
    %20 = tpu.matmul %18, %19, %cst_13 {dimension_numbers = #tpu.dot_dimension_numbers<[1], [0], [0], [1], [0, 0, 1, 1], [], []>} : vector<16x128xbf16>, vector<128x128xbf16>, vector<16x128xf32> -> vector<16x128xf32>
    %21 = arith.addf %17, %20 : vector<16x128xf32>
    %c0_14 = arith.constant 0 : index
    %c0_15 = arith.constant 0 : index
    %22 = vector.load %arg8[%c0_14, %c0_15] : memref<16x128xf32, #tpu.memory_space<vmem>>, vector<16x128xf32>
    tpu.vector_store %arg8[%c0_14, %c0_15], %21 {strides = array<i32>} : memref<16x128xf32, #tpu.memory_space<vmem>>, vector<16x128xf32>,
    %c0_i32_16 = arith.constant 0 : i32
    %23 = arith.cmpi eq, %arg1, %c0_i32_16 : i32
    %24 = arith.extui %23 : i1 to i32
    %c0_i32_17 = arith.constant 0 : i32
    %25 = arith.cmpi ne, %24, %c0_i32_17 : i32
    scf.if %25 {
      %c0_18 = arith.constant 0 : index
      %c0_19 = arith.constant 0 : index
      %26 = vector.load %arg8[%c0_18, %c0_19] : memref<16x128xf32, #tpu.memory_space<vmem>>, vector<16x128xf32>
      %c0_20 = arith.constant 0 : index
      %c0_21 = arith.constant 0 : index
      %27 = vector.load %arg6[%c0_20, %c0_21] : memref<1x128xf32, #tpu.memory_space<vmem>>, vector<1x128xf32>
      %28 = vector.broadcast %27 : vector<1x128xf32> to vector<16x128xf32>
      %29 = arith.addf %26, %28 : vector<16x128xf32>
      %c0_22 = arith.constant 0 : index
      %c0_23 = arith.constant 0 : index
      %30 = vector.load %arg7[%c0_22, %c0_23] : memref<16x128xf32, #tpu.memory_space<vmem>>, vector<16x128xf32>
      tpu.vector_store %arg7[%c0_22, %c0_23], %29 {strides = array<i32>} : memref<16x128xf32, #tpu.memory_space<vmem>>, vector<16x128xf32>,
    } else {
    }
    return
  }
  func.func @transform_0(%arg0: i32, %arg1: i32) -> (i32, i32) {
    %c0_i32 = arith.constant 0 : i32
    %c0_i32_0 = arith.constant 0 : i32
    return %arg0, %c0_i32 : i32, i32
  }
  func.func @transform_1(%arg0: i32, %arg1: i32) -> (i32, i32) {
    %c0_i32 = arith.constant 0 : i32
    %c0_i32_0 = arith.constant 0 : i32
    return %c0_i32, %arg1 : i32, i32
  }
  func.func @transform_2(%arg0: i32, %arg1: i32) -> (i32, i32) {
    %c0_i32 = arith.constant 0 : i32
    %c0_i32_0 = arith.constant 0 : i32
    return %c0_i32, %arg1 : i32, i32
  }
  func.func @transform_3(%arg0: i32, %arg1: i32) -> (i32, i32) {
    %c0_i32 = arith.constant 0 : i32
    %c0_i32_0 = arith.constant 0 : i32
    return %arg1, %c0_i32 : i32, i32
  }
  func.func @transform_4(%arg0: i32, %arg1: i32) -> (i32, i32) {
    %c0_i32 = arith.constant 0 : i32
    %c0_i32_0 = arith.constant 0 : i32
    %c0_i32_1 = arith.constant 0 : i32
    return %c0_i32, %c0_i32_0 : i32, i32
  }
  func.func @transform_5(%arg0: i32, %arg1: i32) -> (i32, i32) {
    %c0_i32 = arith.constant 0 : i32
    %c0_i32_0 = arith.constant 0 : i32
    return %arg0, %c0_i32 : i32, i32
  }
}

</mosaic_0001>

<bundles_post_ra>
// kernel: tpu_custom_call.1
= control target key start
LH: loop header
LB: loop body
LE: loop exit
PB: predicated region body
PF: predicated region fallthrough
CT: control target
= control target key end

     0   :  { %10 = vsyncpa [#allocation4], 0  ;;  %s657_s0 = inlined_call_operand.hbm [shape: bf16[16,128], index: 0, kind: input, shape index: {}]   ;;  %s658_s1 = inlined_call_operand.hbm [shape: bf16[128,128], index: 1, kind: input, shape index: {}]   ;;  %s659_s2 = inlined_call_operand.vmem [shape: f32[1,128], index: 2, kind: input, shape index: {}]   ;;  %s660_s3 = inlined_call_operand.hbm [shape: bf16[128,128], index: 3, kind: input, shape index: {}]   ;;  %s661_s4 = inlined_call_operand.vmem [shape: f32[1,128], index: 4, kind: input, shape index: {}]   ;;  %s662_s5 = inlined_call_operand.hbm [shape: f32[16,128], index: 5, kind: output, shape index: {}]  }
   0x1   :  { %11 = vsyncpa [#allocation7], 0 }
   0x2   :  { %12 = vsyncpa [#allocation5], 0  ;;  %s547_s18 = smov [#allocation6]   ;;  %s548_s20 = smov [#allocation3]  }
   0x3   :  { %s30_s19 = sshll.u32 %s547_s18, 4  ;;  %s18_s21 = sshll.u32 %s548_s20, 4  ;;  %s31_s19 = int_to_ptr.vmem [resolvable:$true] %s30_s19  ;;  %s587_s21 = int_to_ptr.vmem [resolvable:$true] %s18_s21 }
   0x4   :  { %s453_s24 = scalar_lea.hbm %s658_s1, 1024 }
   0x5   :  { %p454_p0 = scmp.ne.s32.totalorder %s658_s1, %s453_s24  ;;  %p457_p1 = scmp.lt.u32.totalorder %s453_s24, %s658_s1 }
   0x7   :  { %p459_p2 = pnand %p457_p1, %p454_p0 }
   0x9   :  { %462 = shalt.err (!%p459_p2)
}
   0xa   :  { %s463_s29 = scalar_lea.vmem %s31_s19, 1024  ;;  %p468_p4 = scmp.lt.s32.totalorder %s31_s19, %s31_s19 }
   0xb   :  { %p464_p3 = scmp.ne.s32.totalorder %s31_s19, %s463_s29  ;;  %p469_p5 = scmp.lt.s32.totalorder %s463_s29, %s463_s29 }
   0xd   :  { %p470_p6 = por %p469_p5, %p468_p4 }
   0xf   :  { %p471_p7 = pnand %p470_p6, %p464_p3 }
  0x11   :  { %474 = shalt.err (!%p471_p7)
}
  0x12   :  { %s549_s30 = smov 64   ;;  %s550_s6 = smov 4  }
  0x13   :  { %36 = dma.hbm_to_vmem [thread:$0]  %s658_s1, 1024, %s31_s19, [#allocation7], %s549_s30, %s549_s30, %s550_s6  }
  0x14   :  { %s475_s11 = scalar_lea.hbm %s657_s0, 128 }
  0x15   :  { %p476_p8 = scmp.ne.s32.totalorder %s657_s0, %s475_s11  ;;  %p479_p9 = scmp.lt.u32.totalorder %s475_s11, %s657_s0 }
  0x17   :  { %p481_p10 = pnand %p479_p9, %p476_p8 }
  0x19   :  { %484 = shalt.err (!%p481_p10)
}
  0x1a   :  { %s485_s16 = scalar_lea.vmem %s587_s21, 128  ;;  %p490_p12 = scmp.lt.s32.totalorder %s587_s21, %s587_s21 }
  0x1b   :  { %p486_p11 = scmp.ne.s32.totalorder %s587_s21, %s485_s16  ;;  %p491_p13 = scmp.lt.s32.totalorder %s485_s16, %s485_s16 }
  0x1d   :  { %p492_p0 = por %p491_p13, %p490_p12 }
  0x1f   :  { %p493_p1 = pnand %p492_p0, %p486_p11 }
  0x21   :  { %496 = shalt.err (!%p493_p1)
}
  0x22   :  { %24 = dma.hbm_to_vmem [thread:$0]  %s657_s0, 128, %s587_s21, [#allocation4], %s549_s30, %s549_s30, %s550_s6  }
  0x23   :  { %s551_s18 = smov [#allocation8]   ;;  %s497_s23 = scalar_lea.hbm %s660_s3, 1024 }
  0x24   :  { %s44_s19 = sshll.u32 %s551_s18, 4  ;;  %p498_p2 = scmp.ne.s32.totalorder %s660_s3, %s497_s23  ;;  %s45_s19 = int_to_ptr.vmem [resolvable:$true] %s44_s19 }
  0x25   :  { %p501_p3 = scmp.lt.u32.totalorder %s497_s23, %s660_s3 }
  0x27   :  { %p503_p4 = pnand %p501_p3, %p498_p2 }
  0x29   :  { %506 = shalt.err (!%p503_p4)
}
  0x2a   :  { %s507_s28 = scalar_lea.vmem %s45_s19, 1024  ;;  %p512_p6 = scmp.lt.s32.totalorder %s45_s19, %s45_s19 }
  0x2b   :  { %p508_p5 = scmp.ne.s32.totalorder %s45_s19, %s507_s28  ;;  %p513_p7 = scmp.lt.s32.totalorder %s507_s28, %s507_s28 }
  0x2d   :  { %p514_p8 = por %p513_p7, %p512_p6 }
  0x2f   :  { %p515_p9 = pnand %p514_p8, %p508_p5 }
  0x31   :  { %518 = shalt.err (!%p515_p9)
}
  0x32   :  { %50 = dma.hbm_to_vmem [thread:$0]  %s660_s3, 1024, %s45_s19, [#allocation7], %s549_s30, %s549_s30, %s550_s6  }
  0x33   :  { %541 = dma.done.wait [#allocation4], 128  }
  0x34   :  { %542 = vsyncadd [#allocation4], 4294967168 }
  0x35   :  { %543 = dma.done.wait [#allocation7], 2048  }
  0x36   :  { %544 = vsyncadd [#allocation7], 4294965248  ;;  %v552_v0 = vmov 0.0   ;;  %vm553_vm0 = vmmov 0   ;;  %v432_v1 = vld [vmem:[#allocation6] sm:$0xff]   ;;  %v433_v2 = vld [vmem:[#allocation6 + $0x8] sm:$0xff]  }
  0x37   :  { %382 = vmatprep.subr.bf16.mxu0 %v552_v0  ;;  %398 = vmatprep.mubr.msk.bf16.mxu0 %vm553_vm0, %v552_v0  ;;  %v434_v3 = vld [vmem:[#allocation6 + $0x10] sm:$0xff]   ;;  %v441_v4 = vld [vmem:[#allocation8] sm:$0xff]   ;;  %v435_v5 = vld [vmem:[#allocation6 + $0x18] sm:$0xff]   ;;  %s554_s6 = smov [#allocation9]  }
  0x38   :  { %402 = vmatprep.subr.bf16.mxu1 %v552_v0  ;;  %418 = vmatprep.mubr.msk.bf16.mxu1 %vm553_vm0, %v552_v0  ;;  %v442_v6 = vld [vmem:[#allocation8 + $0x8] sm:$0xff]   ;;  %v436_v7 = vld [vmem:[#allocation6 + $0x20] sm:$0xff]   ;;  %v438_v9 = vld [vmem:[#allocation6 + $0x30] sm:$0xff]   ;;  %s332_s7 = sshll.u32 %s554_s6, 4  ;;  %s333_s7 = int_to_ptr.vmem [resolvable:$true] %s332_s7 }
  0x39   :  { %383 = vmatpush3.bf16.msra.mxu0 %v432_v1  ;;  %403 = vmatpush3.bf16.msra.mxu1 %v441_v4  ;;  %v437_v8 = vld [vmem:[#allocation6 + $0x28] sm:$0xff]   ;;  %v439_v10 = vld [vmem:[#allocation6 + $0x38] sm:$0xff]   ;;  %v443_v12 = vld [vmem:[#allocation8 + $0x10] sm:$0xff]   ;;  %s519_s8 = scalar_lea.vmem %s333_s7, 256  ;;  %p524_p11 = scmp.lt.s32.totalorder %s333_s7, %s333_s7 }
  0x3a   :  { %384 = vmatprep.subr.bf16.mxu0 %v552_v0  ;;  %404 = vmatprep.subr.bf16.mxu1 %v552_v0  ;;  %v440_v11 = vld [vmem:[#allocation3] sm:$0xff]   ;;  %v445_v14 = vld [vmem:[#allocation8 + $0x20] sm:$0xff]   ;;  %v446_v15 = vld [vmem:[#allocation8 + $0x28] sm:$0xff]   ;;  %p520_p10 = scmp.ne.s32.totalorder %s333_s7, %s519_s8  ;;  %p525_p12 = scmp.lt.s32.totalorder %s519_s8, %s519_s8 }
  0x3b   :  { %v444_v13 = vld [vmem:[#allocation8 + $0x18] sm:$0xff]   ;;  %v447_v16 = vld [vmem:[#allocation8 + $0x30] sm:$0xff]  }
  0x3c   :  { %v448_v17 = vld [vmem:[#allocation8 + $0x38] sm:$0xff]   ;;  %p526_p13 = por %p525_p12, %p524_p11 }
  0x3d   :  { %385 = vmatpush3.bf16.msra.mxu0 %v433_v2  ;;  %405 = vmatpush3.bf16.msra.mxu1 %v442_v6  ;;  %v345_v18 = vld [vmem:[%s659_s2] ss:$0 sm:$0xff] }
  0x3e   :  { %386 = vmatprep.subr.bf16.mxu0 %v552_v0  ;;  %406 = vmatprep.subr.bf16.mxu1 %v552_v0  ;;  %v363_v36 = vld [vmem:[%s661_s4] ss:$0 sm:$0xff]  ;;  %p527_p0 = pnand %p526_p13, %p520_p10 }
  0x41   :  { %387 = vmatpush3.bf16.msra.mxu0 %v434_v3  ;;  %407 = vmatpush3.bf16.msra.mxu1 %v443_v12 }
  0x42   :  { %388 = vmatprep.subr.bf16.mxu0 %v552_v0  ;;  %408 = vmatprep.subr.bf16.mxu1 %v552_v0 }
  0x45   :  { %389 = vmatpush3.bf16.msra.mxu0 %v435_v5  ;;  %409 = vmatpush3.bf16.msra.mxu1 %v444_v13 }
  0x46   :  { %390 = vmatprep.subr.bf16.mxu0 %v552_v0  ;;  %410 = vmatprep.subr.bf16.mxu1 %v552_v0 }
  0x49   :  { %391 = vmatpush3.bf16.msra.mxu0 %v436_v7  ;;  %411 = vmatpush3.bf16.msra.mxu1 %v445_v14 }
  0x4a   :  { %392 = vmatprep.subr.bf16.mxu0 %v552_v0  ;;  %412 = vmatprep.subr.bf16.mxu1 %v552_v0 }
  0x4d   :  { %393 = vmatpush3.bf16.msra.mxu0 %v437_v8  ;;  %413 = vmatpush3.bf16.msra.mxu1 %v446_v15 }
  0x4e   :  { %394 = vmatprep.subr.bf16.mxu0 %v552_v0  ;;  %414 = vmatprep.subr.bf16.mxu1 %v552_v0 }
  0x51   :  { %395 = vmatpush3.bf16.msra.mxu0 %v438_v9  ;;  %415 = vmatpush3.bf16.msra.mxu1 %v447_v16 }
  0x52   :  { %396 = vmatprep.subr.bf16.mxu0 %v552_v0  ;;  %416 = vmatprep.subr.bf16.mxu1 %v552_v0 }
  0x55   :  { %397 = vmatpush3.bf16.msra.mxu0 %v439_v10  ;;  %417 = vmatpush3.bf16.msra.mxu1 %v448_v17 }
  0x58   :  { %399 = vmatmul.mubr.bf16.vlgmr.msra.gmra.mrb[0].mxu0 %v440_v11 }
 0x12b   :  { %v182_v19 = vpop.f32.mrb[0].mxu0 }
 0x12c   :  { %v183_v20 = vadd.f32 %v345_v18, %v182_v19  ;;  %v400_v21 = vpop.f32.mrb[1].mxu0 }
 0x12d   :  { %v185_v22 = vpop.f32.mrb[2].mxu0 }
 0x12e   :  { %v191_v23 = vmul.f32 0.70710677, %v183_v20  ;;  %v186_v24 = vadd.f32 %v345_v18, %v185_v22  ;;  %v401_v25 = vpop.f32.mrb[3].mxu0  ;;  %v189_v30 = vmul.f32 0.5, %v183_v20 }
 0x130   :  { %449 = verf.f32 %v191_v23  ;;  %v192_v26 = vmul.f32 0.70710677, %v186_v24  ;;  %v190_v31 = vmul.f32 0.5, %v186_v24 }
 0x132   :  { %451 = verf.f32 %v192_v26 }
 0x13a   :  { %v450_v27 = vpop.eup %449 }
 0x13b   :  { %v195_v28 = vadd.f32 1.0, %v450_v27 }
 0x13c   :  { %v452_v29 = vpop.eup %451 }
 0x13d   :  { %v196_v32 = vadd.f32 1.0, %v452_v29  ;;  %v197_v33 = vmul.f32 %v195_v28, %v189_v30 }
 0x13f   :  { %v198_v34 = vmul.f32 %v196_v32, %v190_v31 }
 0x141   :  { %v201_v35 = vpack.c.bf16 %v198_v34, %v197_v33 }
 0x143   :  { %419 = vmatmul.mubr.bf16.vlgmr.msra.gmra.mrb[0].mxu1 %v201_v35 }
 0x216   :  { %v300_v37 = vpop.f32.mrb[0].mxu1 }
 0x217   :  { %v323_v38 = vadd.f32 %v363_v36, %v300_v37  ;;  %v420_v39 = vpop.f32.mrb[1].mxu1 }
 0x218   :  { %v303_v40 = vpop.f32.mrb[2].mxu1 }
 0x219   :  { %325 = vst [vmem:[#allocation9] sm:$0xff] %v323_v38  ;;  %v324_v41 = vadd.f32 %v363_v36, %v303_v40  ;;  %v421_v42 = vpop.f32.mrb[3].mxu1 }
 0x21b   :  { %326 = vst [vmem:[#allocation9 + $0x8] sm:$0xff] %v324_v41 }
 0x21c   :  { %530 = shalt.err (!%p527_p0)
}
 0x21d   :  { %s531_s10 = scalar_lea.hbm %s662_s5, 256 }
 0x21e   :  { %p532_p1 = scmp.ne.s32.totalorder %s662_s5, %s531_s10  ;;  %p535_p2 = scmp.lt.u32.totalorder %s531_s10, %s662_s5 }
 0x220   :  { %p537_p3 = pnand %p535_p2, %p532_p1 }
 0x222   :  { %540 = shalt.err (!%p537_p3)
}
 0x223   :  { %s555_s15 = smov 128   ;;  %s556_s16 = smov 8  }
 0x224   :  { %338 = dma.vmem_to_hbm [thread:$0]  %s333_s7, 256, %s662_s5, [#allocation5], %s555_s15, %s555_s15, %s556_s16  }
 0x225   :  { %545 = dma.done.wait [#allocation5], 256  }
 0x226   :  { %546 = vsyncadd [#allocation5], 4294967040 }
 0x227   :  { %342 = vsyncpa [#allocation4], 1 }
 0x228   :  { %343 = vsyncpa [#allocation7], 1 }
 0x229   :  { %344 = vsyncpa [#allocation5], 1 }

</bundles_post_ra>
